<compile_context>
chip_gen: v7x
topology: tpu7x:2x2x1
jax: 0.10.0
libtpu: 0.0.40
codegen_flags: <defaults>
</compile_context>

<pallas_src>
import functools

import jax
import jax.numpy as jnp
from jax import lax
from jax.experimental import pallas as pl
from jax.experimental.pallas import tpu as pltpu


def _round_up(a: int, b: int) -> int:
    return ((a + b - 1) // b) * b


def _vmem_capacity_bytes() -> int:
    try:
        return int(pltpu.get_tpu_info().vmem_capacity_bytes)
    except Exception:
        return 128 * 1024 * 1024  # fallback (also used under CPU interpret mode)


def _hash_bits(seed_u32, rows_u32, cols_u32):
    """Stateless per-element uint32 hash (portable: plain jnp ops only)."""
    z = (rows_u32 * jnp.uint32(0x9E3779B1)) ^ (cols_u32 * jnp.uint32(0x85EBCA6B)) ^ seed_u32
    z = (z ^ (z >> 16)) * jnp.uint32(0x7FEB352D)
    z = (z ^ (z >> 15)) * jnp.uint32(0x846CA68B)
    z = z ^ (z >> 16)
    return z


def _ffn_kernel(seed_ref, x_ref, w1_ref, b1_ref, w2_ref, b2_ref, o_ref, *scratch,
                dropout_rate: float, training: bool, drop_threshold: int,
                n_h: int, tm: int, th: int):
    # x_ref:  (tm, D)   token row tile (compute dtype)
    # w1_ref: (D, th)   hidden-tile of W1       b1_ref: (1, th) f32
    # w2_ref: (th, D)   hidden-tile of W2       b2_ref: (1, D)  f32
    # o_ref:  (tm, D)   output row tile
    # scratch: (acc_ref,) f32 accumulator, only present when n_h > 1
    i = pl.program_id(0)
    h_idx = pl.program_id(1)

    # linear_1 (f32 accumulation on the MXU) + bias + ReLU.
    h = jnp.dot(x_ref[...], w1_ref[...], preferred_element_type=jnp.float32) + b1_ref[...]
    h = jnp.maximum(h, 0.0)
    # Compute-dtype epilogue (bf16 by default): halves intermediate footprint/traffic;
    # the second matmul consumes this dtype anyway.
    h = h.astype(w2_ref.dtype)

    # Inverted dropout (training only): hash-based bits, integer-threshold compare.
    # keep iff bits >= round(p * 2^32); the 1/(1-p) rescale is folded into the small
    # (tm, D) result at finalize.
    if training and dropout_rate > 0.0:
        rows = (lax.broadcasted_iota(jnp.int32, (tm, th), 0) + i * tm).astype(jnp.uint32)
        cols = (lax.broadcasted_iota(jnp.int32, (tm, th), 1) + h_idx * th).astype(jnp.uint32)
        bits = _hash_bits(seed_ref[0].astype(jnp.uint32), rows, cols)
        keep = bits >= jnp.uint32(drop_threshold)
        h = jnp.where(keep, h, jnp.zeros_like(h))

    partial = jnp.dot(h, w2_ref[...], preferred_element_type=jnp.float32)
    scale = (1.0 / (1.0 - dropout_rate)) if (training and dropout_rate > 0.0) else 1.0

    if n_h == 1:
        # Weights-resident / single hidden tile: no accumulator round-trip.
        o_ref[...] = (partial * scale + b2_ref[...]).astype(o_ref.dtype)
    else:
        acc_ref = scratch[0]

        @pl.when(h_idx == 0)
        def _():
            acc_ref[...] = jnp.zeros_like(acc_ref)

        acc_ref[...] += partial

        @pl.when(h_idx == n_h - 1)
        def _():
            o_ref[...] = (acc_ref[...] * scale + b2_ref[...]).astype(o_ref.dtype)


def feed_forward_block(x, w1, b1, w2, b2, *, dropout_rate: float = 0.0,
                       training: bool = False, seed: int = 0,
                       tm: int = 1024, compute_dtype=jnp.bfloat16):
    """x: (batch, seq, in_dim) -> (batch, seq, in_dim).

    Weights are stored transposed vs. PyTorch nn.Linear:
      w1: (in_dim, hidden), b1: (hidden,), w2: (hidden, in_dim), b2: (in_dim,).
    """
    batch, seq, in_dim = x.shape
    hidden = w1.shape[1]
    assert w1.shape == (in_dim, hidden)
    assert w2.shape == (hidden, in_dim)
    assert b1.shape == (hidden,) and b2.shape == (in_dim,)
    assert 0.0 <= dropout_rate < 1.0

    M = batch * seq
    out_dtype = x.dtype
    compute_dtype = jnp.dtype(compute_dtype)
    csz = compute_dtype.itemsize
    osz = jnp.dtype(out_dtype).itemsize
    sublane = {4: 8, 2: 16, 1: 32}.get(csz, 8)

    D = _round_up(in_dim, 128)          # lane-dense padded model dim
    H_pad = _round_up(hidden, 128)      # lane-dense padded hidden dim

    # ---- per-chip VMEM budget (headroom left for compiler-internal scratch) ------------
    cap = _vmem_capacity_bytes()
    budget = max(32 * 1024 * 1024, min(int(cap * 0.8), cap - 12 * 1024 * 1024))

    def vmem_needed(tm_, th_, H_):
        # Conservative: all BlockSpec operands double-buffered, f32 accumulator when the
        # hidden axis is tiled, plus the f32 (tm, th) intermediate.
        w_b = 2 * (D * th_ * csz + th_ * 4 + th_ * D * csz + D * 4)
        x_b = 2 * tm_ * D * csz
        o_b = 2 * tm_ * D * osz
        acc = tm_ * D * 4 if H_ // th_ > 1 else 0
        mid = tm_ * th_ * 4
        return w_b + x_b + o_b + acc + mid

    # ---- tile selection -----------------------------------------------------------------
    tm0 = max(sublane, _round_up(min(tm, max(M, 1)), sublane))
    tm_cands = []
    t = tm0
    while True:
        tm_cands.append(t)
        if t <= sublane:
            break
        t = max(sublane, _round_up(t // 2, sublane))

    chosen = None
    # 1) Weights-resident: th = H_pad -> constant weight index maps, W1/W2 DMA'd once.
    tm_floor = min(256, tm0)
    for tm_c in tm_cands:
        if tm_c < tm_floor:
            break
        if vmem_needed(tm_c, H_pad, H_pad) <= budget:
            chosen = (tm_c, H_pad, H_pad)
            break
    # 2) Hidden-tiled fallback: prefer the largest tm (per-step intensity on the weight
    #    stream scales with tm), then the largest th that fits.
    if chosen is None:
        th_cands = [c for c in (2048, 1024, 512, 256, 128) if c <= H_pad]
        for tm_c in tm_cands:
            for th_c in th_cands:
                H_c = _round_up(hidden, th_c)
                if vmem_needed(tm_c, th_c, H_c) <= budget:
                    chosen = (tm_c, th_c, H_c)
                    break
            if chosen is not None:
                break
    if chosen is None:
        chosen = (sublane, 128, _round_up(hidden, 128))

    tm_, th_, H = chosen
    Mp = _round_up(M, tm_)
    n_h = H // th_
    grid = (Mp // tm_, n_h)

    # ---- operand prep (no-op when already aligned + right dtype) -------------------------
    # TODO(synk): in a real model, pad/cast the weights once at init instead of per call.
    def _prep(a, rows, cols, dtype):
        if a.dtype != dtype:
            a = a.astype(dtype)
        if a.shape != (rows, cols):
            a = jnp.zeros((rows, cols), dtype).at[:a.shape[0], :a.shape[1]].set(a)
        return a

    x2d = _prep(x.reshape(M, in_dim), Mp, D, compute_dtype)
    w1p = _prep(w1, D, H, compute_dtype)
    w2p = _prep(w2, H, D, compute_dtype)
    b1p = _prep(b1.reshape(1, hidden), 1, H, jnp.float32)
    b2p = _prep(b2.reshape(1, in_dim), 1, D, jnp.float32)
    seed_arr = jnp.array([seed], dtype=jnp.int32)

    drop_threshold = min(int(round(dropout_rate * (2 ** 32))), 2 ** 32 - 1)
    kernel = functools.partial(
        _ffn_kernel, dropout_rate=float(dropout_rate), training=bool(training),
        drop_threshold=drop_threshold, n_h=n_h, tm=tm_, th=th_)

    scratch_shapes = [pltpu.VMEM((tm_, D), jnp.float32)] if n_h > 1 else []

    est = vmem_needed(tm_, th_, H)
    vmem_limit = int(min(budget, max(int(est * 1.5), 16 * 1024 * 1024)))

    # Actual HBM traffic: weights read once when resident, once per row tile when tiled.
    w_reads = 1 if n_h == 1 else (Mp // tm_)
    flops = 4 * Mp * D * H
    bytes_accessed = (Mp * D * csz + Mp * D * osz
                      + w_reads * (D * H + H * D) * csz + (H + D) * 4)

    out2d = pl.pallas_call(
        kernel,
        out_shape=jax.ShapeDtypeStruct((Mp, D), out_dtype),
        grid_spec=pltpu.PrefetchScalarGridSpec(
            num_scalar_prefetch=1,                                # dropout seed -> SMEM
            grid=grid,
            in_specs=[
                pl.BlockSpec((tm_, D), lambda i, h, s: (i, 0)),   # x row tile
                pl.BlockSpec((D, th_), lambda i, h, s: (0, h)),   # W1 hidden tile
                pl.BlockSpec((1, th_), lambda i, h, s: (0, h)),   # b1 hidden tile
                pl.BlockSpec((th_, D), lambda i, h, s: (h, 0)),   # W2 hidden tile
                pl.BlockSpec((1, D), lambda i, h, s: (0, 0)),     # b2 (constant)
            ],
            out_specs=pl.BlockSpec((tm_, D), lambda i, h, s: (i, 0)),
            scratch_shapes=scratch_shapes,
        ),
        compiler_params=pltpu.CompilerParams(
            dimension_semantics=("parallel", "arbitrary"),
            vmem_limit_bytes=vmem_limit),
        cost_estimate=pl.CostEstimate(flops=flops, transcendentals=0,
                                      bytes_accessed=bytes_accessed),
    )(seed_arr, x2d, w1p, b1p, w2p, b2p)

    if (Mp, D) != (M, in_dim):
        out2d = out2d[:M, :in_dim]
    return out2d.reshape(batch, seq, in_dim)


def _reference(x, w1, b1, w2, b2):
    h = jnp.maximum(x @ w1 + b1, 0.0)
    return h @ w2 + b2


if __name__ == "__main__":
    # Small shapes consistent with the module's forward.
    batch, seq, in_dim, hidden = 2, 8, 32, 64
    dropout = 0.1

    key = jax.random.PRNGKey(0)
    kx, k1, k2, k3, k4 = jax.random.split(key, 5)

    x = jax.random.normal(kx, (batch, seq, in_dim), dtype=jnp.float32)
    # nn.Linear weights, stored transposed for the kernel.
    w1 = jax.random.normal(k1, (in_dim, hidden), dtype=jnp.float32) * 0.05
    b1 = jax.random.normal(k2, (hidden,), dtype=jnp.float32) * 0.05
    w2 = jax.random.normal(k3, (hidden, in_dim), dtype=jnp.float32) * 0.05
    b2 = jax.random.normal(k4, (in_dim,), dtype=jnp.float32) * 0.05

    ref = _reference(x, w1, b1, w2, b2)

    # Eval mode (dropout = identity), f32 compute -> exact check against pure-JAX ref.
    out_f32 = feed_forward_block(x, w1, b1, w2, b2, dropout_rate=dropout,
                                 training=False, compute_dtype=jnp.float32)
    out_f32 = jax.block_until_ready(out_f32)
    assert out_f32.shape == (batch, seq, in_dim)
    assert jnp.allclose(out_f32, ref, atol=1e-5, rtol=1e-5), "f32 mismatch vs reference"

    # Eval mode, default bf16 matmuls (f32 accumulation) -> loose tolerance.
    out_bf16 = feed_forward_block(x, w1, b1, w2, b2, dropout_rate=dropout,
                                  training=False)
    out_bf16 = jax.block_until_ready(out_bf16)
    assert jnp.allclose(out_bf16, ref, atol=3e-2, rtol=3e-2), "bf16 mismatch vs reference"

    # Training mode: exercises the hash-based inverted-dropout path.
    # (Mask stream intentionally != torch's; check shape / finiteness only.)
    out_tr = feed_forward_block(x, w1, b1, w2, b2, dropout_rate=dropout,
                                training=True, seed=123)
    out_tr = jax.block_until_ready(out_tr)
    assert out_tr.shape == (batch, seq, in_dim)
    assert bool(jnp.all(jnp.isfinite(out_tr)))

    print("KERNEL_OK")
</pallas_src>

<mosaic_0001>
module attributes {stable_mosaic.version = 11 : i64} {
  func.func @_ffn_kernel(%arg0: i32, %arg1: i32, %arg2: memref<1xi32, #tpu.memory_space<smem>>, %arg3: memref<16x128xf32, #tpu.memory_space<vmem>>, %arg4: memref<128x128xf32, #tpu.memory_space<vmem>>, %arg5: memref<1x128xf32, #tpu.memory_space<vmem>>, %arg6: memref<128x128xf32, #tpu.memory_space<vmem>>, %arg7: memref<1x128xf32, #tpu.memory_space<vmem>>, %arg8: memref<16x128xf32, #tpu.memory_space<vmem>>) attributes {dimension_semantics = [#tpu.dimension_semantics<parallel>, #tpu.dimension_semantics<arbitrary>], iteration_bounds = array<i64: 1, 1>, scalar_prefetch = 1 : i64, scratch_operands = 0 : i64, tpu.core_type = #tpu.core_type<tc>, window_params = [{transform_indices = @transform_0, window_bounds = array<i64: 16, 128>}, {transform_indices = @transform_1, window_bounds = array<i64: 128, 128>}, {transform_indices = @transform_2, window_bounds = array<i64: 1, 128>}, {transform_indices = @transform_3, window_bounds = array<i64: 128, 128>}, {pipeline_mode = #tpu.pipeline_mode<synchronous>, transform_indices = @transform_4, window_bounds = array<i64: 1, 128>}, {transform_indices = @transform_5, window_bounds = array<i64: 16, 128>}]} {
    %c0 = arith.constant 0 : index
    %c0_0 = arith.constant 0 : index
    %0 = vector.load %arg3[%c0, %c0_0] : memref<16x128xf32, #tpu.memory_space<vmem>>, vector<16x128xf32>
    %c0_1 = arith.constant 0 : index
    %c0_2 = arith.constant 0 : index
    %1 = vector.load %arg4[%c0_1, %c0_2] : memref<128x128xf32, #tpu.memory_space<vmem>>, vector<128x128xf32>
    %cst = arith.constant dense<0.000000e+00> : vector<16x128xf32>
    %2 = tpu.matmul %0, %1, %cst {dimension_numbers = #tpu.dot_dimension_numbers<[1], [0], [0], [1], [0, 0, 1, 1], [], []>} : vector<16x128xf32>, vector<128x128xf32>, vector<16x128xf32> -> vector<16x128xf32>
    %c0_3 = arith.constant 0 : index
    %c0_4 = arith.constant 0 : index
    %3 = vector.load %arg5[%c0_3, %c0_4] : memref<1x128xf32, #tpu.memory_space<vmem>>, vector<1x128xf32>
    %4 = vector.broadcast %3 : vector<1x128xf32> to vector<16x128xf32>
    %5 = arith.addf %2, %4 : vector<16x128xf32>
    %cst_5 = arith.constant 0.000000e+00 : f32
    %6 = vector.broadcast %cst_5 : f32 to vector<16x128xf32>
    %7 = arith.maximumf %5, %6 : vector<16x128xf32>
    %c0_6 = arith.constant 0 : index
    %c0_7 = arith.constant 0 : index
    %8 = vector.load %arg6[%c0_6, %c0_7] : memref<128x128xf32, #tpu.memory_space<vmem>>, vector<128x128xf32>
    %cst_8 = arith.constant dense<0.000000e+00> : vector<16x128xf32>
    %9 = tpu.matmul %7, %8, %cst_8 {dimension_numbers = #tpu.dot_dimension_numbers<[1], [0], [0], [1], [0, 0, 1, 1], [], []>} : vector<16x128xf32>, vector<128x128xf32>, vector<16x128xf32> -> vector<16x128xf32>
    %cst_9 = arith.constant 1.000000e+00 : f32
    %10 = vector.broadcast %cst_9 : f32 to vector<16x128xf32>
    %11 = arith.mulf %9, %10 : vector<16x128xf32>
    %c0_10 = arith.constant 0 : index
    %c0_11 = arith.constant 0 : index
    %12 = vector.load %arg7[%c0_10, %c0_11] : memref<1x128xf32, #tpu.memory_space<vmem>>, vector<1x128xf32>
    %13 = vector.broadcast %12 : vector<1x128xf32> to vector<16x128xf32>
    %14 = arith.addf %11, %13 : vector<16x128xf32>
    %c0_12 = arith.constant 0 : index
    %c0_13 = arith.constant 0 : index
    %15 = vector.load %arg8[%c0_12, %c0_13] : memref<16x128xf32, #tpu.memory_space<vmem>>, vector<16x128xf32>
    tpu.vector_store %arg8[%c0_12, %c0_13], %14 {strides = array<i32>} : memref<16x128xf32, #tpu.memory_space<vmem>>, vector<16x128xf32>,
    return
  }
  func.func @transform_0(%arg0: i32, %arg1: i32, %arg2: memref<1xi32, #tpu.memory_space<smem>>) -> (i32, i32) {
    %c0_i32 = arith.constant 0 : i32
    %c0_i32_0 = arith.constant 0 : i32
    return %arg0, %c0_i32 : i32, i32
  }
  func.func @transform_1(%arg0: i32, %arg1: i32, %arg2: memref<1xi32, #tpu.memory_space<smem>>) -> (i32, i32) {
    %c0_i32 = arith.constant 0 : i32
    %c0_i32_0 = arith.constant 0 : i32
    return %c0_i32, %arg1 : i32, i32
  }
  func.func @transform_2(%arg0: i32, %arg1: i32, %arg2: memref<1xi32, #tpu.memory_space<smem>>) -> (i32, i32) {
    %c0_i32 = arith.constant 0 : i32
    %c0_i32_0 = arith.constant 0 : i32
    return %c0_i32, %arg1 : i32, i32
  }
  func.func @transform_3(%arg0: i32, %arg1: i32, %arg2: memref<1xi32, #tpu.memory_space<smem>>) -> (i32, i32) {
    %c0_i32 = arith.constant 0 : i32
    %c0_i32_0 = arith.constant 0 : i32
    return %arg1, %c0_i32 : i32, i32
  }
  func.func @transform_4(%arg0: i32, %arg1: i32, %arg2: memref<1xi32, #tpu.memory_space<smem>>) -> (i32, i32) {
    %c0_i32 = arith.constant 0 : i32
    %c0_i32_0 = arith.constant 0 : i32
    %c0_i32_1 = arith.constant 0 : i32
    return %c0_i32, %c0_i32_0 : i32, i32
  }
  func.func @transform_5(%arg0: i32, %arg1: i32, %arg2: memref<1xi32, #tpu.memory_space<smem>>) -> (i32, i32) {
    %c0_i32 = arith.constant 0 : i32
    %c0_i32_0 = arith.constant 0 : i32
    return %arg0, %c0_i32 : i32, i32
  }
}

</mosaic_0001>

<bundles_post_ra>
// kernel: tpu_custom_call.1
= control target key start
LH: loop header
LB: loop body
LE: loop exit
PB: predicated region body
PF: predicated region fallthrough
CT: control target
= control target key end

     0   :  { %12 = vsyncpa [#allocation5], 0  ;;  %s670_s0 = inlined_call_operand.<no memory space> [shape: s32[1], index: 0, kind: input, shape index: {}]   ;;  %s671_s1 = inlined_call_operand.hbm [shape: f32[16,128], index: 1, kind: input, shape index: {}]   ;;  %s672_s2 = inlined_call_operand.hbm [shape: f32[128,128], index: 2, kind: input, shape index: {}]   ;;  %s673_s3 = inlined_call_operand.vmem [shape: f32[1,128], index: 3, kind: input, shape index: {}]   ;;  %s674_s4 = inlined_call_operand.hbm [shape: f32[128,128], index: 4, kind: input, shape index: {}]   ;;  %s675_s5 = inlined_call_operand.vmem [shape: f32[1,128], index: 5, kind: input, shape index: {}]   ;;  %s676_s6 = inlined_call_operand.hbm [shape: f32[16,128], index: 6, kind: output, shape index: {}]  }
   0x1   :  { %13 = vsyncpa [#allocation8], 0 }
   0x2   :  { %14 = vsyncpa [#allocation6], 0  ;;  %s556_s0 = smov [#allocation7]   ;;  %s557_s22 = smov [#allocation4]  }
   0x3   :  { %s32_s21 = sshll.u32 %s556_s0, 4  ;;  %s20_s23 = sshll.u32 %s557_s22, 4  ;;  %s33_s21 = int_to_ptr.vmem [resolvable:$true] %s32_s21  ;;  %s597_s23 = int_to_ptr.vmem [resolvable:$true] %s20_s23 }
   0x4   :  { %s462_s26 = scalar_lea.hbm %s672_s2, 2048 }
   0x5   :  { %p463_p0 = scmp.ne.s32.totalorder %s672_s2, %s462_s26  ;;  %p466_p1 = scmp.lt.u32.totalorder %s462_s26, %s672_s2 }
   0x7   :  { %p468_p2 = pnand %p466_p1, %p463_p0 }
   0x9   :  { %471 = shalt.err (!%p468_p2)
}
   0xa   :  { %s472_s7 = scalar_lea.vmem %s33_s21, 2048  ;;  %p477_p4 = scmp.lt.s32.totalorder %s33_s21, %s33_s21 }
   0xb   :  { %p473_p3 = scmp.ne.s32.totalorder %s33_s21, %s472_s7  ;;  %p478_p5 = scmp.lt.s32.totalorder %s472_s7, %s472_s7 }
   0xd   :  { %p479_p6 = por %p478_p5, %p477_p4 }
   0xf   :  { %p480_p7 = pnand %p479_p6, %p473_p3 }
  0x11   :  { %483 = shalt.err (!%p480_p7)
}
  0x12   :  { %s558_s8 = smov 128   ;;  %s559_s9 = smov 8  }
  0x13   :  { %38 = dma.hbm_to_vmem [thread:$0]  %s672_s2, 2048, %s33_s21, [#allocation8], %s558_s8, %s558_s8, %s559_s9  }
  0x14   :  { %s484_s14 = scalar_lea.hbm %s671_s1, 256 }
  0x15   :  { %p485_p8 = scmp.ne.s32.totalorder %s671_s1, %s484_s14  ;;  %p488_p9 = scmp.lt.u32.totalorder %s484_s14, %s671_s1 }
  0x17   :  { %p490_p10 = pnand %p488_p9, %p485_p8 }
  0x19   :  { %493 = shalt.err (!%p490_p10)
}
  0x1a   :  { %s494_s19 = scalar_lea.vmem %s597_s23, 256  ;;  %p499_p12 = scmp.lt.s32.totalorder %s597_s23, %s597_s23 }
  0x1b   :  { %p495_p11 = scmp.ne.s32.totalorder %s597_s23, %s494_s19  ;;  %p500_p13 = scmp.lt.s32.totalorder %s494_s19, %s494_s19 }
  0x1d   :  { %p501_p0 = por %p500_p13, %p499_p12 }
  0x1f   :  { %p502_p1 = pnand %p501_p0, %p495_p11 }
  0x21   :  { %505 = shalt.err (!%p502_p1)
}
  0x22   :  { %26 = dma.hbm_to_vmem [thread:$0]  %s671_s1, 256, %s597_s23, [#allocation5], %s558_s8, %s558_s8, %s559_s9  }
  0x23   :  { %s560_s0 = smov [#allocation9]   ;;  %s506_s25 = scalar_lea.hbm %s674_s4, 2048 }
  0x24   :  { %s46_s21 = sshll.u32 %s560_s0, 4  ;;  %p507_p2 = scmp.ne.s32.totalorder %s674_s4, %s506_s25  ;;  %s47_s21 = int_to_ptr.vmem [resolvable:$true] %s46_s21 }
  0x25   :  { %p510_p3 = scmp.lt.u32.totalorder %s506_s25, %s674_s4 }
  0x27   :  { %p512_p4 = pnand %p510_p3, %p507_p2 }
  0x29   :  { %515 = shalt.err (!%p512_p4)
}
  0x2a   :  { %s516_s30 = scalar_lea.vmem %s47_s21, 2048  ;;  %p521_p6 = scmp.lt.s32.totalorder %s47_s21, %s47_s21 }
  0x2b   :  { %p517_p5 = scmp.ne.s32.totalorder %s47_s21, %s516_s30  ;;  %p522_p7 = scmp.lt.s32.totalorder %s516_s30, %s516_s30 }
  0x2d   :  { %p523_p8 = por %p522_p7, %p521_p6 }
  0x2f   :  { %p524_p9 = pnand %p523_p8, %p517_p5 }
  0x31   :  { %527 = shalt.err (!%p524_p9)
}
  0x32   :  { %52 = dma.hbm_to_vmem [thread:$0]  %s674_s4, 2048, %s47_s21, [#allocation8], %s558_s8, %s558_s8, %s559_s9  }
  0x33   :  { %550 = dma.done.wait [#allocation5], 256  }
  0x34   :  { %551 = vsyncadd [#allocation5], 4294967040 }
  0x35   :  { %552 = dma.done.wait [#allocation8], 4096  }
  0x36   :  { %553 = vsyncadd [#allocation8], 4294963200  ;;  %v66_v0 = vld [vmem:[#allocation7] sm:$0xff]  ;;  %v67_v1 = vld [vmem:[#allocation7 + $0x8] sm:$0xff]  ;;  %s561_s12 = smov [#allocation10]  }
  0x37   :  { %v68_v2 = vld [vmem:[#allocation7 + $0x10] sm:$0xff]  ;;  %v392_v3 = vpack.c.bf16 %v67_v1, %v66_v0  ;;  %v69_v4 = vld [vmem:[#allocation7 + $0x18] sm:$0xff]  ;;  %v70_v6 = vld [vmem:[#allocation7 + $0x20] sm:$0xff]  ;;  %s271_s13 = sshll.u32 %s561_s12, 4  ;;  %s272_s13 = int_to_ptr.vmem [resolvable:$true] %s271_s13 }
  0x38   :  { %v396_v5 = vpack.c.bf16 %v69_v4, %v68_v2  ;;  %v71_v7 = vld [vmem:[#allocation7 + $0x28] sm:$0xff]  ;;  %v72_v9 = vld [vmem:[#allocation7 + $0x30] sm:$0xff]  ;;  %v73_v10 = vld [vmem:[#allocation7 + $0x38] sm:$0xff]  ;;  %p533_p11 = scmp.lt.s32.totalorder %s272_s13, %s272_s13 }
  0x39   :  { %393 = vmatprep.subr.bf16.mxu0 %v392_v3  ;;  %v400_v8 = vpack.c.bf16 %v71_v7, %v70_v6  ;;  %v64_v11 = vld [vmem:[#allocation4] sm:$0xff]  ;;  %v166_v12 = vld [vmem:[#allocation9] sm:$0xff]  ;;  %v167_v13 = vld [vmem:[#allocation9 + $0x8] sm:$0xff]  ;;  %v404_v20 = vpack.c.bf16 %v73_v10, %v72_v9 }
  0x3a   :  { %395 = vmatpush3.bf16.msra.mxu0 %v392_v3  ;;  %354 = vmatprep.mubr.f32.mxu0 %v64_v11  ;;  %v168_v14 = vld [vmem:[#allocation9 + $0x10] sm:$0xff]  ;;  %v424_v15 = vpack.c.bf16 %v167_v13, %v166_v12  ;;  %v169_v16 = vld [vmem:[#allocation9 + $0x18] sm:$0xff]  ;;  %v170_v18 = vld [vmem:[#allocation9 + $0x20] sm:$0xff] }
  0x3b   :  { %397 = vmatprep.subr.bf16.mxu0 %v396_v5  ;;  %v428_v17 = vpack.c.bf16 %v169_v16, %v168_v14  ;;  %v171_v19 = vld [vmem:[#allocation9 + $0x28] sm:$0xff]  ;;  %v74_v21 = vld [vmem:[#allocation7 + $0x40] sm:$0xff]  ;;  %v172_v24 = vld [vmem:[#allocation9 + $0x30] sm:$0xff] }
  0x3c   :  { %425 = vmatprep.subr.bf16.mxu1 %v424_v15  ;;  %v75_v22 = vld [vmem:[#allocation7 + $0x48] sm:$0xff]  ;;  %v432_v23 = vpack.c.bf16 %v171_v19, %v170_v18  ;;  %v173_v25 = vld [vmem:[#allocation9 + $0x38] sm:$0xff]  ;;  %v76_v27 = vld [vmem:[#allocation7 + $0x50] sm:$0xff] }
  0x3d   :  { %427 = vmatpush3.bf16.msra.mxu1 %v424_v15  ;;  %v408_v26 = vpack.c.bf16 %v75_v22, %v74_v21  ;;  %v77_v28 = vld [vmem:[#allocation7 + $0x58] sm:$0xff]  ;;  %v436_v29 = vpack.c.bf16 %v173_v25, %v172_v24  ;;  %v174_v30 = vld [vmem:[#allocation9 + $0x40] sm:$0xff]  ;;  %v175_v31 = vld [vmem:[#allocation9 + $0x48] sm:$0xff] }
  0x3e   :  { %399 = vmatpush3.bf16.msra.mxu0 %v396_v5  ;;  %429 = vmatprep.subr.bf16.mxu1 %v428_v17  ;;  %v412_v32 = vpack.c.bf16 %v77_v28, %v76_v27  ;;  %v78_v33 = vld [vmem:[#allocation7 + $0x60] sm:$0xff]  ;;  %v79_v34 = vld [vmem:[#allocation7 + $0x68] sm:$0xff]  ;;  %v440_v35 = vpack.c.bf16 %v175_v31, %v174_v30  ;;  %v176_v36 = vld [vmem:[#allocation9 + $0x50] sm:$0xff] }
  0x3f   :  { %401 = vmatprep.subr.bf16.mxu0 %v400_v8  ;;  %v177_v37 = vld [vmem:[#allocation9 + $0x58] sm:$0xff]  ;;  %v416_v38 = vpack.c.bf16 %v79_v34, %v78_v33  ;;  %v80_v39 = vld [vmem:[#allocation7 + $0x70] sm:$0xff]  ;;  %v178_v42 = vld [vmem:[#allocation9 + $0x60] sm:$0xff] }
  0x40   :  { %v81_v40 = vld [vmem:[#allocation7 + $0x78] sm:$0xff]  ;;  %v444_v41 = vpack.c.bf16 %v177_v37, %v176_v36  ;;  %v179_v43 = vld [vmem:[#allocation9 + $0x68] sm:$0xff]  ;;  %v180_v47 = vld [vmem:[#allocation9 + $0x70] sm:$0xff] }
  0x41   :  { %431 = vmatpush3.bf16.msra.mxu1 %v428_v17  ;;  %v420_v44 = vpack.c.bf16 %v81_v40, %v80_v39  ;;  %v448_v45 = vpack.c.bf16 %v179_v43, %v178_v42  ;;  %v65_v46 = vld [vmem:[#allocation4 + $0x8] sm:$0xff]  ;;  %v284_v50 = vld [vmem:[%s673_s3] ss:$0 sm:$0xff]  ;;  %s528_s3 = scalar_lea.vmem %s272_s13, 256 }
  0x42   :  { %403 = vmatpush3.bf16.msra.mxu0 %v400_v8  ;;  %433 = vmatprep.subr.bf16.mxu1 %v432_v23  ;;  %v181_v48 = vld [vmem:[#allocation9 + $0x78] sm:$0xff]  ;;  %v285_v57 = vld [vmem:[%s675_s5] ss:$0 sm:$0xff]  ;;  %p529_p10 = scmp.ne.s32.totalorder %s272_s13, %s528_s3  ;;  %p534_p12 = scmp.lt.s32.totalorder %s528_s3, %s528_s3 }
  0x43   :  { %405 = vmatprep.subr.bf16.mxu0 %v404_v20  ;;  %v452_v49 = vpack.c.bf16 %v181_v48, %v180_v47 }
  0x44   :  { %p535_p13 = por %p534_p12, %p533_p11 }
  0x45   :  { %435 = vmatpush3.bf16.msra.mxu1 %v432_v23 }
  0x46   :  { %407 = vmatpush3.bf16.msra.mxu0 %v404_v20  ;;  %437 = vmatprep.subr.bf16.mxu1 %v436_v29  ;;  %p536_p0 = pnand %p535_p13, %p529_p10 }
  0x47   :  { %409 = vmatprep.subr.bf16.mxu0 %v408_v26 }
  0x49   :  { %439 = vmatpush3.bf16.msra.mxu1 %v436_v29 }
  0x4a   :  { %411 = vmatpush3.bf16.msra.mxu0 %v408_v26  ;;  %441 = vmatprep.subr.bf16.mxu1 %v440_v35 }
  0x4b   :  { %413 = vmatprep.subr.bf16.mxu0 %v412_v32 }
  0x4d   :  { %443 = vmatpush3.bf16.msra.mxu1 %v440_v35 }
  0x4e   :  { %415 = vmatpush3.bf16.msra.mxu0 %v412_v32  ;;  %445 = vmatprep.subr.bf16.mxu1 %v444_v41 }
  0x4f   :  { %417 = vmatprep.subr.bf16.mxu0 %v416_v38 }
  0x51   :  { %447 = vmatpush3.bf16.msra.mxu1 %v444_v41 }
  0x52   :  { %419 = vmatpush3.bf16.msra.mxu0 %v416_v38  ;;  %449 = vmatprep.subr.bf16.mxu1 %v448_v45 }
  0x53   :  { %421 = vmatprep.subr.bf16.mxu0 %v420_v44 }
  0x55   :  { %451 = vmatpush3.bf16.msra.mxu1 %v448_v45 }
  0x56   :  { %423 = vmatpush3.bf16.msra.mxu0 %v420_v44  ;;  %453 = vmatprep.subr.bf16.mxu1 %v452_v49 }
  0x59   :  { %355 = vmatmul.mubr.f32.vlgmr.msra.gmra.mrb[0].mxu0 %v65_v46  ;;  %455 = vmatpush3.bf16.msra.mxu1 %v452_v49 }
 0x12c   :  { %v356_v51 = vpop.f32.mrb[0].mxu0 }
 0x12d   :  { %v161_v52 = vadd.f32 %v356_v51, %v284_v50  ;;  %v155_v53 = vpop.f32.mrb[1].mxu0 }
 0x12e   :  { %v156_v54 = vadd.f32 %v284_v50, %v155_v53 }
 0x12f   :  { %v165_v56 = vmax.f32 %v161_v52, 0.0 }
 0x130   :  { %v164_v55 = vmax.f32 %v156_v54, 0.0 }
 0x132   :  { %389 = vmatprep.mubr.f32.mxu1 %v164_v55 }
 0x133   :  { %390 = vmatmul.mubr.f32.vlgmr.msra.gmra.mrb[0].mxu1 %v165_v56 }
 0x206   :  { %v391_v58 = vpop.f32.mrb[0].mxu1 }
 0x207   :  { %v261_v59 = vadd.f32 %v391_v58, %v285_v57  ;;  %v255_v60 = vpop.f32.mrb[1].mxu1 }
 0x208   :  { %v256_v61 = vadd.f32 %v285_v57, %v255_v60 }
 0x209   :  { %265 = vst [vmem:[#allocation10 + $0x8] sm:$0xff] %v261_v59 }
 0x20a   :  { %264 = vst [vmem:[#allocation10] sm:$0xff] %v256_v61 }
 0x20b   :  { %539 = shalt.err (!%p536_p0)
}
 0x20c   :  { %s540_s5 = scalar_lea.hbm %s676_s6, 256 }
 0x20d   :  { %p541_p1 = scmp.ne.s32.totalorder %s676_s6, %s540_s5  ;;  %p544_p2 = scmp.lt.u32.totalorder %s540_s5, %s676_s6 }
 0x20f   :  { %p546_p3 = pnand %p544_p2, %p541_p1 }
 0x211   :  { %549 = shalt.err (!%p546_p3)
}
 0x212   :  { %277 = dma.vmem_to_hbm [thread:$0]  %s272_s13, 256, %s676_s6, [#allocation6], %s558_s8, %s558_s8, %s559_s9  }
 0x213   :  { %554 = dma.done.wait [#allocation6], 256  }
 0x214   :  { %555 = vsyncadd [#allocation6], 4294967040 }
 0x215   :  { %281 = vsyncpa [#allocation5], 1 }
 0x216   :  { %282 = vsyncpa [#allocation8], 1 }
 0x217   :  { %283 = vsyncpa [#allocation6], 1 }

</bundles_post_ra>
